<compile_context>
chip_gen: v7x
topology: tpu7x:2x2x1
jax: 0.10.0
libtpu: 0.0.40
codegen_flags: <defaults>
</compile_context>

<pallas_src>
import functools

import jax
import jax.numpy as jnp
from jax.experimental import pallas as pl
from jax.experimental.pallas import tpu as pltpu


def _round_up(x, m):
    return ((x + m - 1) // m) * m


def _pick_bt(B, N, Dp, num_layers, budget_bytes=24 * 1024 * 1024):
    """Batch-block size: target >=256 matmul rows/step, stay under VMEM budget."""
    # double-buffered weights + biases (grid-constant, but Pallas still buffers)
    fixed = 2 * 4 * num_layers * (Dp * Dp + Dp)
    # per-graph double-buffered feat + h + adj + pooled g (f32)
    per_graph = 2 * 4 * (2 * N * Dp + N * N + num_layers * Dp)
    avail = max(budget_bytes - fixed, per_graph)
    max_bt = max(1, avail // per_graph)
    target = max(1, -(-256 // N))                # ceil(256 / N) rows per step
    bt = int(min(B, target, max_bt))
    while B % bt:                                # make the grid cover B exactly
        bt -= 1
    return bt


def gcn_fused_kernel(feat_ref, adj_ref, w_ref, bias_ref, alpha_ref,
                     h_ref, g_ref, *, num_layers):
    # feat_ref: (Bt, N, Dp)   adj_ref: (Bt, N, N)
    # w_ref:    (L, Dp, Dp)   pre-transposed: contraction is x @ W
    # bias_ref: (L, 1, Dp)    alpha_ref: (L,) in SMEM
    # h_ref:    (Bt, N, Dp)   g_ref: (Bt, L, Dp)
    Bt, N, Dp = feat_ref.shape
    x = feat_ref[...].astype(jnp.float32)            # (Bt, N, Dp)
    adj = adj_ref[...].astype(jnp.float32)           # (Bt, N, N)

    for l in range(num_layers):                      # static unroll over layers
        w = w_ref[l]                                 # (Dp, Dp)
        # Linear (no bias): flatten batch*nodes -> one tall matmul for the MXU.
        xw = jnp.dot(x.reshape(Bt * N, Dp), w,
                     preferred_element_type=jnp.float32)
        xw = xw.reshape(Bt, N, Dp)
        # Graph propagation: out[b] = adj[b] @ xw[b]
        out = jnp.einsum("bij,bjf->bif", adj, xw,
                         preferred_element_type=jnp.float32)
        # Bias add (padded lanes carry zero bias)
        out = out + bias_ref[l]
        # PReLU, single shared alpha (scalar read from SMEM)
        alpha = alpha_ref[l]
        out = jnp.where(out >= 0.0, out, alpha * out)
        # Node-sum pooling for this layer, lane-dense (Bt, Dp) store.
        g_ref[:, l, :] = jnp.sum(out, axis=1).astype(g_ref.dtype)
        x = out

    h_ref[...] = x.astype(h_ref.dtype)


def _gcn_forward_impl(feat, adj, params, num_layers):
    B, N, Fin = feat.shape
    Fout = params[0][0].shape[0]
    Dp = max(_round_up(Fin, 128), _round_up(Fout, 128))
    L = num_layers

    # Stack & pad parameters: W -> transposed (Fin, Fout) then zero-padded to
    # (Dp, Dp); bias -> (1, Dp); alpha -> scalar.  Padded lanes stay exactly 0
    # through every layer (0-weight cols, 0 bias, PReLU(0)=0).
    w_list, b_list, a_list = [], [], []
    for (w, b, a) in params:
        out_ft, in_ft = w.shape
        wt = jnp.zeros((Dp, Dp), jnp.float32).at[:in_ft, :out_ft].set(
            w.astype(jnp.float32).T)
        bp = jnp.zeros((1, Dp), jnp.float32).at[:, :out_ft].set(
            b.astype(jnp.float32).reshape(1, -1))
        w_list.append(wt)
        b_list.append(bp)
        a_list.append(jnp.asarray(a, jnp.float32).reshape(()))
    w_stack = jnp.stack(w_list, axis=0)               # (L, Dp, Dp)
    b_stack = jnp.stack(b_list, axis=0)               # (L, 1, Dp)
    a_stack = jnp.stack(a_list, axis=0)               # (L,)

    feat_p = jnp.zeros((B, N, Dp), jnp.float32).at[:, :, :Fin].set(
        feat.astype(jnp.float32))
    adj_f = adj.astype(jnp.float32)

    Bt = _pick_bt(B, N, Dp, L)
    grid = (B // Bt,)

    kernel = functools.partial(gcn_fused_kernel, num_layers=L)

    h_pad, g_pad = pl.pallas_call(
        kernel,
        out_shape=(
            jax.ShapeDtypeStruct((B, N, Dp), jnp.float32),
            jax.ShapeDtypeStruct((B, L, Dp), jnp.float32),
        ),
        grid=grid,
        in_specs=[
            pl.BlockSpec((Bt, N, Dp), lambda i: (i, 0, 0)),      # feat block
            pl.BlockSpec((Bt, N, N), lambda i: (i, 0, 0)),       # adj block
            pl.BlockSpec((L, Dp, Dp), lambda i: (0, 0, 0)),      # stacked W
            pl.BlockSpec((L, 1, Dp), lambda i: (0, 0, 0)),       # stacked bias
            pl.BlockSpec(memory_space=pltpu.MemorySpace.SMEM),   # alphas
        ],
        out_specs=(
            pl.BlockSpec((Bt, N, Dp), lambda i: (i, 0, 0)),      # final h
            pl.BlockSpec((Bt, L, Dp), lambda i: (i, 0, 0)),      # pooled g, all layers
        ),
        compiler_params=pltpu.CompilerParams(
            dimension_semantics=("parallel",),
            vmem_limit_bytes=32 * 1024 * 1024,
        ),
    )(feat_p, adj_f, w_stack, b_stack, a_stack)

    h = h_pad[:, :, :Fout]
    g = g_pad[:, :, :Fout].reshape(B, L * Fout)       # == concat of per-layer sums
    return h, g


@functools.partial(jax.jit, static_argnames=("num_layers",))
def gcn_forward(feat, adj, mask, params, num_layers):
    # `mask` is accepted but unused, matching the PyTorch forward signature.
    del mask
    return _gcn_forward_impl(feat, adj, params, num_layers)


def xavier_uniform(key, out_ft, in_ft, dtype=jnp.float32):
    # torch.nn.init.xavier_uniform_ on a (out_ft, in_ft) Linear weight.
    bound = (6.0 / (in_ft + out_ft)) ** 0.5
    return jax.random.uniform(key, (out_ft, in_ft), dtype,
                              minval=-bound, maxval=bound)


def init_gcn_params(key, in_ft, out_ft, num_layers):
    params = []
    dims = [in_ft] + [out_ft] * num_layers
    for i in range(num_layers):
        key, sub = jax.random.split(key)
        w = xavier_uniform(sub, dims[i + 1], dims[i])
        b = jnp.zeros((1, dims[i + 1]), jnp.float32)      # bias init 0.0
        a = jnp.full((), 0.25, jnp.float32)               # PReLU default alpha
        params.append((w, b, a))
    return params


def gcn_forward_ref(feat, adj, params, num_layers):
    # Pure-JAX reference for correctness checking.
    def layer(x, w, b, a):
        out = jnp.einsum("bnk,bkf->bnf", adj, x @ w.T) + b.reshape(1, 1, -1)
        return jnp.where(out >= 0, out, a * out)

    w, b, a = params[0]
    h = layer(feat, w, b, a)
    g = jnp.sum(h, axis=1)
    for idx in range(num_layers - 1):
        w, b, a = params[idx + 1]
        h = layer(h, w, b, a)
        g = jnp.concatenate((g, jnp.sum(h, axis=1)), axis=-1)
    return h, g


if __name__ == "__main__":
    B, N, IN_FT, OUT_FT, NUM_LAYERS = 2, 8, 16, 32, 2

    key = jax.random.PRNGKey(0)
    k_feat, k_adj, k_param = jax.random.split(key, 3)

    feat = jax.random.normal(k_feat, (B, N, IN_FT), jnp.float32)
    adj_raw = jax.random.uniform(k_adj, (B, N, N), jnp.float32)
    adj = (adj_raw + jnp.swapaxes(adj_raw, 1, 2)) * 0.5   # symmetric "adjacency"
    mask = jnp.ones((B, N), jnp.float32)                  # unused, as in PyTorch

    params = init_gcn_params(k_param, IN_FT, OUT_FT, NUM_LAYERS)

    h_1, h_1g = gcn_forward(feat, adj, mask, params, NUM_LAYERS)
    jax.block_until_ready((h_1, h_1g))

    # sanity: shapes + match to pure-JAX reference
    assert h_1.shape == (B, N, OUT_FT)
    assert h_1g.shape == (B, OUT_FT * NUM_LAYERS)
    h_ref, g_ref = gcn_forward_ref(feat, adj, params, NUM_LAYERS)
    assert jnp.allclose(h_1, h_ref, atol=1e-4, rtol=1e-4)
    assert jnp.allclose(h_1g, g_ref, atol=1e-4, rtol=1e-4)

    print("KERNEL_OK")
</pallas_src>

<mosaic_0001>
module attributes {stable_mosaic.version = 11 : i64} {
  func.func @gcn_fused_kernel(%arg0: i32, %arg1: memref<2x8x128xf32, #tpu.memory_space<vmem>>, %arg2: memref<2x8x8xf32, #tpu.memory_space<vmem>>, %arg3: memref<2x128x128xf32, #tpu.memory_space<vmem>>, %arg4: memref<2x1x128xf32, #tpu.memory_space<vmem>>, %arg5: memref<2xf32, #tpu.memory_space<smem>>, %arg6: memref<2x8x128xf32, #tpu.memory_space<vmem>>, %arg7: memref<2x2x128xf32, #tpu.memory_space<vmem>>) attributes {dimension_semantics = [#tpu.dimension_semantics<parallel>], iteration_bounds = array<i64: 1>, scalar_prefetch = 0 : i64, scratch_operands = 0 : i64, tpu.core_type = #tpu.core_type<tc>, window_params = [{transform_indices = @transform_0, window_bounds = array<i64: 2, 8, 128>}, {transform_indices = @transform_1, window_bounds = array<i64: 2, 8, 8>}, {pipeline_mode = #tpu.pipeline_mode<synchronous>, transform_indices = @transform_2, window_bounds = array<i64: 2, 128, 128>}, {pipeline_mode = #tpu.pipeline_mode<synchronous>, transform_indices = @transform_3, window_bounds = array<i64: 2, 1, 128>}, {transform_indices = @transform_4, window_bounds = array<i64: 2>}, {transform_indices = @transform_5, window_bounds = array<i64: 2, 8, 128>}, {transform_indices = @transform_6, window_bounds = array<i64: 2, 2, 128>}]} {
    %c0 = arith.constant 0 : index
    %c0_0 = arith.constant 0 : index
    %c0_1 = arith.constant 0 : index
    %0 = vector.load %arg1[%c0, %c0_0, %c0_1] : memref<2x8x128xf32, #tpu.memory_space<vmem>>, vector<2x8x128xf32>
    %c0_2 = arith.constant 0 : index
    %c0_3 = arith.constant 0 : index
    %c0_4 = arith.constant 0 : index
    %1 = vector.load %arg2[%c0_2, %c0_3, %c0_4] : memref<2x8x8xf32, #tpu.memory_space<vmem>>, vector<2x8x8xf32>
    %c0_5 = arith.constant 0 : index
    %c0_6 = arith.constant 0 : index
    %c0_7 = arith.constant 0 : index
    %2 = vector.load %arg3[%c0_5, %c0_6, %c0_7] : memref<2x128x128xf32, #tpu.memory_space<vmem>>, vector<1x128x128xf32>
    %3 = vector.shape_cast %2 : vector<1x128x128xf32> to vector<128x128xf32>
    %4 = vector.shape_cast %0 : vector<2x8x128xf32> to vector<16x128xf32>
    %cst = arith.constant dense<0.000000e+00> : vector<16x128xf32>
    %5 = tpu.matmul %4, %3, %cst {dimension_numbers = #tpu.dot_dimension_numbers<[1], [0], [0], [1], [0, 0, 1, 1], [], []>} : vector<16x128xf32>, vector<128x128xf32>, vector<16x128xf32> -> vector<16x128xf32>
    %6 = vector.shape_cast %5 : vector<16x128xf32> to vector<2x8x128xf32>
    "tpu.trace_start"() <{level = 10 : i32, message = "bij,bjf->bif"}> : () -> ()
    %cst_8 = arith.constant dense<0.000000e+00> : vector<2x8x128xf32>
    %7 = tpu.matmul %1, %6, %cst_8 {dimension_numbers = #tpu.dot_dimension_numbers<[2], [1], [1], [2], [0, 0, 0, 1, 1, 2], [0], [0]>} : vector<2x8x8xf32>, vector<2x8x128xf32>, vector<2x8x128xf32> -> vector<2x8x128xf32>
    "tpu.trace_stop"() : () -> ()
    %c0_9 = arith.constant 0 : index
    %c0_10 = arith.constant 0 : index
    %c0_11 = arith.constant 0 : index
    %8 = vector.load %arg4[%c0_9, %c0_10, %c0_11] : memref<2x1x128xf32, #tpu.memory_space<vmem>>, vector<1x1x128xf32>
    %9 = vector.shape_cast %8 : vector<1x1x128xf32> to vector<1x128xf32>
    %10 = vector.shape_cast %9 : vector<1x128xf32> to vector<1x1x128xf32>
    %11 = vector.broadcast %10 : vector<1x1x128xf32> to vector<2x8x128xf32>
    %12 = arith.addf %7, %11 : vector<2x8x128xf32>
    %c0_12 = arith.constant 0 : index
    %13 = memref.load %arg5[%c0_12] : memref<2xf32, #tpu.memory_space<smem>>
    %cst_13 = arith.constant 0.000000e+00 : f32
    %14 = vector.broadcast %cst_13 : f32 to vector<2x8x128xf32>
    %15 = arith.cmpf oge, %12, %14 : vector<2x8x128xf32>
    %16 = vector.broadcast %13 : f32 to vector<2x8x128xf32>
    %17 = arith.mulf %16, %12 : vector<2x8x128xf32>
    %18 = arith.select %15, %12, %17 : vector<2x8x128xi1>, vector<2x8x128xf32>
    %cst_14 = arith.constant dense<0.000000e+00> : vector<2x128xf32>
    %19 = vector.multi_reduction <add>, %18, %cst_14 [1] : vector<2x8x128xf32> to vector<2x128xf32>
    %c0_15 = arith.constant 0 : index
    %c0_16 = arith.constant 0 : index
    %c0_17 = arith.constant 0 : index
    %20 = vector.load %arg7[%c0_15, %c0_16, %c0_17] : memref<2x2x128xf32, #tpu.memory_space<vmem>>, vector<2x1x128xf32>
    %21 = vector.shape_cast %20 : vector<2x1x128xf32> to vector<2x128xf32>
    %22 = vector.shape_cast %19 : vector<2x128xf32> to vector<2x1x128xf32>
    tpu.vector_store %arg7[%c0_15, %c0_16, %c0_17], %22 {strides = array<i32>} : memref<2x2x128xf32, #tpu.memory_space<vmem>>, vector<2x1x128xf32>,
    %c1 = arith.constant 1 : index
    %c0_18 = arith.constant 0 : index
    %c0_19 = arith.constant 0 : index
    %23 = vector.load %arg3[%c1, %c0_18, %c0_19] : memref<2x128x128xf32, #tpu.memory_space<vmem>>, vector<1x128x128xf32>
    %24 = vector.shape_cast %23 : vector<1x128x128xf32> to vector<128x128xf32>
    %25 = vector.shape_cast %18 : vector<2x8x128xf32> to vector<16x128xf32>
    %cst_20 = arith.constant dense<0.000000e+00> : vector<16x128xf32>
    %26 = tpu.matmul %25, %24, %cst_20 {dimension_numbers = #tpu.dot_dimension_numbers<[1], [0], [0], [1], [0, 0, 1, 1], [], []>} : vector<16x128xf32>, vector<128x128xf32>, vector<16x128xf32> -> vector<16x128xf32>
    %27 = vector.shape_cast %26 : vector<16x128xf32> to vector<2x8x128xf32>
    "tpu.trace_start"() <{level = 10 : i32, message = "bij,bjf->bif"}> : () -> ()
    %cst_21 = arith.constant dense<0.000000e+00> : vector<2x8x128xf32>
    %28 = tpu.matmul %1, %27, %cst_21 {dimension_numbers = #tpu.dot_dimension_numbers<[2], [1], [1], [2], [0, 0, 0, 1, 1, 2], [0], [0]>} : vector<2x8x8xf32>, vector<2x8x128xf32>, vector<2x8x128xf32> -> vector<2x8x128xf32>
    "tpu.trace_stop"() : () -> ()
    %c1_22 = arith.constant 1 : index
    %c0_23 = arith.constant 0 : index
    %c0_24 = arith.constant 0 : index
    %29 = vector.load %arg4[%c1_22, %c0_23, %c0_24] : memref<2x1x128xf32, #tpu.memory_space<vmem>>, vector<1x1x128xf32>
    %30 = vector.shape_cast %29 : vector<1x1x128xf32> to vector<1x128xf32>
    %31 = vector.shape_cast %30 : vector<1x128xf32> to vector<1x1x128xf32>
    %32 = vector.broadcast %31 : vector<1x1x128xf32> to vector<2x8x128xf32>
    %33 = arith.addf %28, %32 : vector<2x8x128xf32>
    %c1_25 = arith.constant 1 : index
    %34 = memref.load %arg5[%c1_25] : memref<2xf32, #tpu.memory_space<smem>>
    %cst_26 = arith.constant 0.000000e+00 : f32
    %35 = vector.broadcast %cst_26 : f32 to vector<2x8x128xf32>
    %36 = arith.cmpf oge, %33, %35 : vector<2x8x128xf32>
    %37 = vector.broadcast %34 : f32 to vector<2x8x128xf32>
    %38 = arith.mulf %37, %33 : vector<2x8x128xf32>
    %39 = arith.select %36, %33, %38 : vector<2x8x128xi1>, vector<2x8x128xf32>
    %cst_27 = arith.constant dense<0.000000e+00> : vector<2x128xf32>
    %40 = vector.multi_reduction <add>, %39, %cst_27 [1] : vector<2x8x128xf32> to vector<2x128xf32>
    %c0_28 = arith.constant 0 : index
    %c1_29 = arith.constant 1 : index
    %c0_30 = arith.constant 0 : index
    %41 = vector.load %arg7[%c0_28, %c1_29, %c0_30] : memref<2x2x128xf32, #tpu.memory_space<vmem>>, vector<2x1x128xf32>
    %42 = vector.shape_cast %41 : vector<2x1x128xf32> to vector<2x128xf32>
    %43 = vector.shape_cast %40 : vector<2x128xf32> to vector<2x1x128xf32>
    tpu.vector_store %arg7[%c0_28, %c1_29, %c0_30], %43 {strides = array<i32>} : memref<2x2x128xf32, #tpu.memory_space<vmem>>, vector<2x1x128xf32>,
    %c0_31 = arith.constant 0 : index
    %c0_32 = arith.constant 0 : index
    %c0_33 = arith.constant 0 : index
    %44 = vector.load %arg6[%c0_31, %c0_32, %c0_33] : memref<2x8x128xf32, #tpu.memory_space<vmem>>, vector<2x8x128xf32>
    tpu.vector_store %arg6[%c0_31, %c0_32, %c0_33], %39 {strides = array<i32>} : memref<2x8x128xf32, #tpu.memory_space<vmem>>, vector<2x8x128xf32>,
    return
  }
  func.func @transform_0(%arg0: i32) -> (i32, i32, i32) {
    %c0_i32 = arith.constant 0 : i32
    %c0_i32_0 = arith.constant 0 : i32
    %c0_i32_1 = arith.constant 0 : i32
    return %arg0, %c0_i32, %c0_i32_0 : i32, i32, i32
  }
  func.func @transform_1(%arg0: i32) -> (i32, i32, i32) {
    %c0_i32 = arith.constant 0 : i32
    %c0_i32_0 = arith.constant 0 : i32
    %c0_i32_1 = arith.constant 0 : i32
    return %arg0, %c0_i32, %c0_i32_0 : i32, i32, i32
  }
  func.func @transform_2(%arg0: i32) -> (i32, i32, i32) {
    %c0_i32 = arith.constant 0 : i32
    %c0_i32_0 = arith.constant 0 : i32
    %c0_i32_1 = arith.constant 0 : i32
    %c0_i32_2 = arith.constant 0 : i32
    return %c0_i32, %c0_i32_0, %c0_i32_1 : i32, i32, i32
  }
  func.func @transform_3(%arg0: i32) -> (i32, i32, i32) {
    %c0_i32 = arith.constant 0 : i32
    %c0_i32_0 = arith.constant 0 : i32
    %c0_i32_1 = arith.constant 0 : i32
    %c0_i32_2 = arith.constant 0 : i32
    return %c0_i32, %c0_i32_0, %c0_i32_1 : i32, i32, i32
  }
  func.func @transform_4(%arg0: i32) -> i32 {
    %c0_i32 = arith.constant 0 : i32
    %c0_i32_0 = arith.constant 0 : i32
    return %c0_i32 : i32
  }
  func.func @transform_5(%arg0: i32) -> (i32, i32, i32) {
    %c0_i32 = arith.constant 0 : i32
    %c0_i32_0 = arith.constant 0 : i32
    %c0_i32_1 = arith.constant 0 : i32
    return %arg0, %c0_i32, %c0_i32_0 : i32, i32, i32
  }
  func.func @transform_6(%arg0: i32) -> (i32, i32, i32) {
    %c0_i32 = arith.constant 0 : i32
    %c0_i32_0 = arith.constant 0 : i32
    %c0_i32_1 = arith.constant 0 : i32
    return %arg0, %c0_i32, %c0_i32_0 : i32, i32, i32
  }
}

</mosaic_0001>

<bundles_post_ra>
// kernel: gcn_forward.1
= control target key start
LH: loop header
LB: loop body
LE: loop exit
PB: predicated region body
PF: predicated region fallthrough
CT: control target
= control target key end

     0   :  { %12 = vsyncpa [#allocation4], 0  ;;  %s1064_s0 = inlined_call_operand.vmem [shape: f32[2,8,128], index: 0, kind: input, shape index: {}]   ;;  %s1065_s1 = inlined_call_operand.vmem [shape: f32[2,8,8], index: 1, kind: input, shape index: {}]   ;;  %s1066_s2 = inlined_call_operand.vmem [shape: f32[2,128,128], index: 2, kind: input, shape index: {}]   ;;  %s1067_s3 = inlined_call_operand.vmem [shape: f32[2,1,128], index: 3, kind: input, shape index: {}]   ;;  %s1068_s4 = inlined_call_operand.vmem [shape: f32[2], index: 4, kind: input, shape index: {}]   ;;  %s1069_s5 = inlined_call_operand.hbm [shape: f32[2,8,128], index: 5, kind: output, shape index: {0}]   ;;  %s1070_s6 = inlined_call_operand.vmem [shape: f32[2,2,128], index: 6, kind: output, shape index: {1}]  }
   0x1   :  { %13 = vsyncpa [#allocation3], 0  ;;  %s28_s23 = sshll.u32 %s1068_s4, 4  ;;  %s29_s23 = int_to_ptr.vmem [resolvable:$true] %s28_s23 }
   0x2   :  { %s820_s24 = scalar_lea.vmem %s29_s23, 16  ;;  %p825_p1 = scmp.lt.s32.totalorder %s29_s23, %s29_s23 }
   0x3   :  { %p821_p0 = scmp.ne.s32.totalorder %s29_s23, %s820_s24  ;;  %p826_p2 = scmp.lt.s32.totalorder %s820_s24, %s820_s24 }
   0x5   :  { %p827_p3 = por %p826_p2, %p825_p1 }
   0x7   :  { %p828_p4 = pnand %p827_p3, %p821_p0 }
   0x9   :  { %831 = shalt.err (!%p828_p4)
}
   0xa   :  { %s858_s25 = smov [#allocation2]  }
   0xb   :  { %31 = dma.vmem_to_smem %s29_s23, 16, %s858_s25, [#allocation4]  }
   0xc   :  { %854 = dma.done.wait [#allocation4], 16  }
   0xd   :  { %855 = vsyncadd [#allocation4], 4294967280 }
   0xe   :  { %35 = sfence }
   0xf   :  { %v40_v0 = vld [vmem:[%s1066_s2] sm:$0xff]  ;;  %v41_v1 = vld [vmem:[%s1066_s2 + $0x8] sm:$0xff]  ;;  %v42_v2 = vld [vmem:[%s1066_s2 + $0x10] sm:$0xff]  ;;  %v859_v26 = vmov 0.0   ;;  %vm860_vm0 = vmmov 0   ;;  %vm138_vm1 = vcmask 64512  }
  0x10   :  { %v750_v3 = vpack.c.bf16 %v41_v1, %v40_v0  ;;  %v43_v4 = vld [vmem:[%s1066_s2 + $0x18] sm:$0xff]  ;;  %v44_v6 = vld [vmem:[%s1066_s2 + $0x20] sm:$0xff]  ;;  %v45_v7 = vld [vmem:[%s1066_s2 + $0x28] sm:$0xff]  ;;  %695 = vmatprep.subr.mxu1 %v859_v26  ;;  %697 = vmatprep.mubr.msk.f32.mxu1 %vm860_vm0, %v859_v26  ;;  %s285_s20 = sld [smem:[#allocation2]]  ;;  %s615_s26 = sld [smem:[#allocation2 + $0x1]] }
  0x11   :  { %v754_v5 = vpack.c.bf16 %v43_v4, %v42_v2  ;;  %v758_v8 = vpack.c.bf16 %v45_v7, %v44_v6  ;;  %v36_v9 = vld [vmem:[%s1064_s0] sm:$0xff]  ;;  %v46_v10 = vld [vmem:[%s1066_s2 + $0x30] sm:$0xff]  ;;  %v47_v11 = vld [vmem:[%s1066_s2 + $0x38] sm:$0xff] }
  0x12   :  { %751 = vmatprep.subr.bf16.mxu0 %v750_v3  ;;  %692 = vmatprep.mubr.f32.mxu0 %v36_v9  ;;  %v762_v12 = vpack.c.bf16 %v47_v11, %v46_v10  ;;  %v48_v13 = vld [vmem:[%s1066_s2 + $0x40] sm:$0xff]  ;;  %v49_v14 = vld [vmem:[%s1066_s2 + $0x48] sm:$0xff]  ;;  %v50_v16 = vld [vmem:[%s1066_s2 + $0x50] sm:$0xff] }
  0x13   :  { %753 = vmatpush3.bf16.msra.mxu0 %v750_v3  ;;  %v766_v15 = vpack.c.bf16 %v49_v14, %v48_v13  ;;  %v51_v17 = vld [vmem:[%s1066_s2 + $0x58] sm:$0xff]  ;;  %v52_v19 = vld [vmem:[%s1066_s2 + $0x60] sm:$0xff]  ;;  %v53_v20 = vld [vmem:[%s1066_s2 + $0x68] sm:$0xff] }
  0x14   :  { %755 = vmatprep.subr.bf16.mxu0 %v754_v5  ;;  %v770_v18 = vpack.c.bf16 %v51_v17, %v50_v16  ;;  %v774_v21 = vpack.c.bf16 %v53_v20, %v52_v19  ;;  %v54_v22 = vld [vmem:[%s1066_s2 + $0x70] sm:$0xff]  ;;  %v55_v23 = vld [vmem:[%s1066_s2 + $0x78] sm:$0xff]  ;;  %v37_v25 = vld [vmem:[%s1064_s0 + $0x8] sm:$0xff] }
  0x15   :  { %v778_v24 = vpack.c.bf16 %v55_v23, %v54_v22  ;;  %v595_v27 = vld [vmem:[%s1066_s2 + $0x80] sm:$0xff]  ;;  %v596_v28 = vld [vmem:[%s1066_s2 + $0x88] sm:$0xff]  ;;  %v597_v33 = vld [vmem:[%s1066_s2 + $0x90] sm:$0xff] }
  0x16   :  { %v971_v30 = vld [vmem:[%s1065_s1] sm:$0xff]  ;;  %v782_v32 = vpack.c.bf16 %v596_v28, %v595_v27  ;;  %v598_v34 = vld [vmem:[%s1066_s2 + $0x98] sm:$0xff]  ;;  %v987_v35 = vld [vmem:[%s1065_s1 + $0x8] sm:$0xff]  ;;  %v288_v57 = vstv %s285_s20  ;;  %s861_s1 = smov [#allocation5]  }
  0x17   :  { %757 = vmatpush3.bf16.msra.mxu0 %v754_v5  ;;  %v786_v36 = vpack.c.bf16 %v598_v34, %v597_v33  ;;  %v599_v37 = vld [vmem:[%s1066_s2 + $0xa0] sm:$0xff]  ;;  %v600_v38 = vld [vmem:[%s1066_s2 + $0xa8] sm:$0xff]  ;;  %v601_v40 = vld [vmem:[%s1066_s2 + $0xb0] sm:$0xff]  ;;  %v550_v19 = vstv %s615_s26  ;;  %s576_s29 = sshll.u32 %s861_s1, 4  ;;  %s577_s29 = int_to_ptr.vmem [resolvable:$true] %s576_s29 }
  0x18   :  { %759 = vmatprep.subr.bf16.mxu0 %v758_v8  ;;  %v790_v39 = vpack.c.bf16 %v600_v38, %v599_v37  ;;  %v602_v41 = vld [vmem:[%s1066_s2 + $0xb8] sm:$0xff]  ;;  %v603_v43 = vld [vmem:[%s1066_s2 + $0xc0] sm:$0xff]  ;;  %v604_v44 = vld [vmem:[%s1066_s2 + $0xc8] sm:$0xff]  ;;  %p837_p6 = scmp.lt.s32.totalorder %s577_s29, %s577_s29 }
  0x19   :  { %v794_v42 = vpack.c.bf16 %v602_v41, %v601_v40  ;;  %v798_v45 = vpack.c.bf16 %v604_v44, %v603_v43  ;;  %v605_v46 = vld [vmem:[%s1066_s2 + $0xd0] sm:$0xff]  ;;  %v606_v47 = vld [vmem:[%s1066_s2 + $0xd8] sm:$0xff]  ;;  %v607_v49 = vld [vmem:[%s1066_s2 + $0xe0] sm:$0xff] }
  0x1a   :  { %v802_v48 = vpack.c.bf16 %v606_v47, %v605_v46  ;;  %v608_v50 = vld [vmem:[%s1066_s2 + $0xe8] sm:$0xff]  ;;  %v609_v52 = vld [vmem:[%s1066_s2 + $0xf0] sm:$0xff]  ;;  %v610_v53 = vld [vmem:[%s1066_s2 + $0xf8] sm:$0xff] }
  0x1b   :  { %761 = vmatpush3.bf16.msra.mxu0 %v758_v8  ;;  %v806_v51 = vpack.c.bf16 %v608_v50, %v607_v49  ;;  %v810_v54 = vpack.c.bf16 %v610_v53, %v609_v52  ;;  %v592_v55 = vld [vmem:[%s1067_s3] ss:$0 sm:$0xff]  ;;  %v612_v17 = vld [vmem:[%s1067_s3 + $0x1] ss:$0 sm:$0xff]  ;;  %s832_s3 = scalar_lea.vmem %s577_s29, 256 }
  0x1c   :  { %763 = vmatprep.subr.bf16.mxu0 %v762_v12  ;;  %p833_p5 = scmp.ne.s32.totalorder %s577_s29, %s832_s3  ;;  %p838_p7 = scmp.lt.s32.totalorder %s832_s3, %s832_s3 }
  0x1e   :  { %p839_p8 = por %p838_p7, %p837_p6 }
  0x1f   :  { %765 = vmatpush3.bf16.msra.mxu0 %v762_v12 }
  0x20   :  { %767 = vmatprep.subr.bf16.mxu0 %v766_v15  ;;  %p840_p9 = pnand %p839_p8, %p833_p5 }
  0x23   :  { %769 = vmatpush3.bf16.msra.mxu0 %v766_v15 }
  0x24   :  { %771 = vmatprep.subr.bf16.mxu0 %v770_v18 }
  0x27   :  { %773 = vmatpush3.bf16.msra.mxu0 %v770_v18 }
  0x28   :  { %775 = vmatprep.subr.bf16.mxu0 %v774_v21 }
  0x2b   :  { %777 = vmatpush3.bf16.msra.mxu0 %v774_v21 }
  0x2c   :  { %779 = vmatprep.subr.bf16.mxu0 %v778_v24 }
  0x2f   :  { %781 = vmatpush3.bf16.msra.mxu0 %v778_v24 }
  0x30   :  { %740 = vmatprep.subr.mxu0 %v859_v26 }
  0x32   :  { %693 = vmatmul.mubr.f32.vlgmr.msra.gmra.mrb[0].mxu0 %v37_v25 }
  0x33   :  { %742 = vmatprep.mubr.msk.f32.mxu0 %vm860_vm0, %v859_v26 }
 0x105   :  { %v694_v29 = vpop.f32.mrb[0].mxu0 }
 0x106   :  { %v122_v31 = vpop.f32.mrb[1].mxu0 }
 0x107   :  { %696 = vmatpush3.msra.mxu1 %v122_v31 }
 0x108   :  { %698 = vmatmul.mubr.msk.f32.vlgmr.msra.gmra.mrb[0].mxu1 %vm138_vm1, %v971_v30  ;;  %700 = vmatprep.subr.mxu1 %v859_v26 }
 0x109   :  { %701 = vmatpush3.msra.mxu1 %v694_v29  ;;  %702 = vmatprep.mubr.msk.f32.mxu1 %vm860_vm0, %v859_v26 }
 0x10a   :  { %783 = vmatprep.subr.bf16.mxu1 %v782_v32 }
 0x10c   :  { %703 = vmatmul.mubr.msk.f32.vlgmr.msra.gmra.mrb[2].mxu1 %vm138_vm1, %v987_v35 }
 0x10d   :  { %785 = vmatpush3.bf16.msra.mxu1 %v782_v32 }
 0x10e   :  { %787 = vmatprep.subr.bf16.mxu1 %v786_v36 }
 0x111   :  { %789 = vmatpush3.bf16.msra.mxu1 %v786_v36 }
 0x112   :  { %791 = vmatprep.subr.bf16.mxu1 %v790_v39 }
 0x115   :  { %793 = vmatpush3.bf16.msra.mxu1 %v790_v39 }
 0x116   :  { %795 = vmatprep.subr.bf16.mxu1 %v794_v42 }
 0x119   :  { %797 = vmatpush3.bf16.msra.mxu1 %v794_v42 }
 0x11a   :  { %799 = vmatprep.subr.bf16.mxu1 %v798_v45 }
 0x11d   :  { %801 = vmatpush3.bf16.msra.mxu1 %v798_v45 }
 0x11e   :  { %803 = vmatprep.subr.bf16.mxu1 %v802_v48 }
 0x121   :  { %805 = vmatpush3.bf16.msra.mxu1 %v802_v48 }
 0x122   :  { %807 = vmatprep.subr.bf16.mxu1 %v806_v51 }
 0x125   :  { %809 = vmatpush3.bf16.msra.mxu1 %v806_v51 }
 0x126   :  { %811 = vmatprep.subr.bf16.mxu1 %v810_v54 }
 0x129   :  { %813 = vmatpush3.bf16.msra.mxu1 %v810_v54 }
 0x1db   :  { %v208_v56 = vpop.f32.mrb[0].mxu1 }
 0x1dc   :  { %v209_v58 = vadd.f32 %v592_v55, %v208_v56  ;;  %v699_v59 = vpop.f32.mrb[1].mxu1 }
 0x1de   :  { %v289_v60 = vmul.f32 %v288_v57, %v209_v58  ;;  %vm286_vm2 = vcmp.ge.f32.partialorder %v209_v58, 0.0 }
 0x1df   :  { %v281_v61 = vpop.f32.mrb[2].mxu1 }
 0x1e0   :  { %v282_v62 = vadd.f32 %v592_v55, %v281_v61  ;;  %v704_v63 = vpop.f32.mrb[3].mxu1  ;;  %v291_v0 = vsel %vm286_vm2, %v209_v58, %v289_v60 }
 0x1e1   :  { %v293_v1 = vrot.slane %v291_v0, 4  ;;  %737 = vmatprep.mubr.f32.mxu1 %v291_v0 }
 0x1e2   :  { %vm287_vm3 = vcmp.ge.f32.partialorder %v282_v62, 0.0  ;;  %v290_v2 = vmul.f32 %v288_v57, %v282_v62 }
 0x1e3   :  { %v294_v3 = vadd.f32 %v293_v1, %v291_v0 }
 0x1e4   :  { %v292_v4 = vsel %vm287_vm3, %v282_v62, %v290_v2 }
 0x1e5   :  { %v295_v5 = vrot.slane %v294_v3, 2  ;;  %v299_v6 = vrot.slane %v292_v4, 4  ;;  %738 = vmatmul.mubr.f32.vlgmr.msra.gmra.mrb[4].mxu1 %v292_v4 }
 0x1e7   :  { %v296_v7 = vadd.f32 %v295_v5, %v294_v3  ;;  %v300_v8 = vadd.f32 %v299_v6, %v292_v4 }
 0x1e9   :  { %v297_v9 = vrot.slane %v296_v7, 1  ;;  %v301_v10 = vrot.slane %v300_v8, 2 }
 0x1eb   :  { %v298_v11 = vadd.f32 %v297_v9, %v296_v7  ;;  %v302_v12 = vadd.f32 %v301_v10, %v300_v8 }
 0x1ed   :  { %305 = vst [vmem:[%s1070_s6] sm:$0x1] %v298_v11  ;;  %v303_v13 = vrot.slane %v302_v12, 1 }
 0x1ef   :  { %v304_v14 = vadd.f32 %v303_v13, %v302_v12 }
 0x1f1   :  { %306 = vst [vmem:[%s1070_s6 + $0x2] sm:$0x1] %v304_v14 }
 0x2b8   :  { %v739_v15 = vpop.f32.mrb[4].mxu1 }
 0x2b9   :  { %v390_v16 = vpop.f32.mrb[5].mxu1 }
 0x2ba   :  { %741 = vmatpush3.msra.mxu0 %v390_v16 }
 0x2bb   :  { %743 = vmatmul.mubr.msk.f32.vlgmr.msra.gmra.mrb[2].mxu0 %vm138_vm1, %v971_v30  ;;  %745 = vmatprep.subr.mxu0 %v859_v26 }
 0x2bc   :  { %746 = vmatpush3.msra.mxu0 %v739_v15  ;;  %747 = vmatprep.mubr.msk.f32.mxu0 %vm860_vm0, %v859_v26 }
 0x2bf   :  { %748 = vmatmul.mubr.msk.f32.vlgmr.msra.gmra.mrb[4].mxu0 %vm138_vm1, %v987_v35 }
 0x38e   :  { %v473_v18 = vpop.f32.mrb[2].mxu0 }
 0x38f   :  { %v474_v20 = vadd.f32 %v612_v17, %v473_v18  ;;  %v744_v21 = vpop.f32.mrb[3].mxu0 }
 0x391   :  { %vm548_vm4 = vcmp.ge.f32.partialorder %v474_v20, 0.0  ;;  %v551_v22 = vmul.f32 %v550_v19, %v474_v20 }
 0x392   :  { %v543_v23 = vpop.f32.mrb[4].mxu0 }
 0x393   :  { %v553_v24 = vsel %vm548_vm4, %v474_v20, %v551_v22  ;;  %v544_v25 = vadd.f32 %v612_v17, %v543_v23  ;;  %v749_v26 = vpop.f32.mrb[5].mxu0 }
 0x394   :  { %v555_v27 = vrot.slane %v553_v24, 4  ;;  %569 = vst [vmem:[#allocation5] sm:$0xff] %v553_v24 }
 0x395   :  { %vm549_vm5 = vcmp.ge.f32.partialorder %v544_v25, 0.0  ;;  %v552_v28 = vmul.f32 %v550_v19, %v544_v25 }
 0x396   :  { %v556_v29 = vadd.f32 %v555_v27, %v553_v24 }
 0x397   :  { %v554_v30 = vsel %vm549_vm5, %v544_v25, %v552_v28 }
 0x398   :  { %v557_v31 = vrot.slane %v556_v29, 2  ;;  %v561_v32 = vrot.slane %v554_v30, 4  ;;  %570 = vst [vmem:[#allocation5 + $0x8] sm:$0xff] %v554_v30 }
 0x399   :  { %843 = shalt.err (!%p840_p9)
}
 0x39a   :  { %s844_s7 = scalar_lea.hbm %s1069_s5, 256 }
 0x39b   :  { %p845_p10 = scmp.ne.s32.totalorder %s1069_s5, %s844_s7  ;;  %p848_p11 = scmp.lt.u32.totalorder %s844_s7, %s1069_s5 }
 0x39d   :  { %p850_p12 = pnand %p848_p11, %p845_p10 }
 0x39f   :  { %853 = shalt.err (!%p850_p12)
}
 0x3a0   :  { %s862_s12 = smov 128   ;;  %s863_s13 = smov 8   ;;  %v558_v33 = vadd.f32 %v557_v31, %v556_v29  ;;  %v562_v34 = vadd.f32 %v561_v32, %v554_v30 }
 0x3a1   :  { %582 = dma.vmem_to_hbm [thread:$0]  %s577_s29, 256, %s1069_s5, [#allocation3], %s862_s12, %s862_s12, %s863_s13  }
 0x3a2   :  { %v559_v35 = vrot.slane %v558_v33, 1  ;;  %v563_v36 = vrot.slane %v562_v34, 2 }
 0x3a4   :  { %v560_v37 = vadd.f32 %v559_v35, %v558_v33  ;;  %v564_v38 = vadd.f32 %v563_v36, %v562_v34 }
 0x3a6   :  { %567 = vst [vmem:[%s1070_s6 + $0x1] sm:$0x1] %v560_v37  ;;  %v565_v39 = vrot.slane %v564_v38, 1 }
 0x3a8   :  { %v566_v40 = vadd.f32 %v565_v39, %v564_v38 }
 0x3aa   :  { %568 = vst [vmem:[%s1070_s6 + $0x3] sm:$0x1] %v566_v40 }
 0x3ab   :  { %856 = dma.done.wait [#allocation3], 256  }
 0x3ac   :  { %857 = vsyncadd [#allocation3], 4294967040 }
 0x3ad   :  { %590 = vsyncpa [#allocation3], 1 }
 0x3ae   :  { %591 = vsyncpa [#allocation4], 1 }

</bundles_post_ra>
